<compile_context>
chip_gen: v7x
topology: tpu7x:2x2x1
jax: 0.10.0
libtpu: 0.0.40
codegen_flags: <defaults>
</compile_context>

<pallas_src>
import jax
import jax.numpy as jnp
from jax import lax
from jax.experimental import pallas as pl
from jax.experimental.pallas import tpu as pltpu


def _round_up(n: int, m: int) -> int:
    return ((n + m - 1) // m) * m


def _choose_batch_tiling(B: int, tb_target: int):
    """Pick (TB, B_pad, n_steps) so that:
       - TB is a multiple of 8 (sublane granularity),
       - tiles stay near tb_target rows and padding waste is a few rows/step,
       - the grid has >= 2 steps when the batch allows (v7x 2-TC split)."""
    n_steps = max(1, int(round(B / float(tb_target))))
    if B >= 16:                      # enough rows for two >=8-row tiles
        n_steps = max(n_steps, 2)    # let both v7x TensorCores get work
    TB = _round_up(-(-B // n_steps), 8)          # ceil(B / n_steps) -> 8-row multiple
    B_pad = n_steps * TB
    return TB, B_pad, n_steps


def _toy_kernel(x_ref, m_ref, b_ref, ln_w_ref, ln_b_ref, o_ref):
    x = x_ref[...]            # (TB, F) f32 batch tile

    # Fused matmuls: y = x @ W.T @ W + b == x @ M + b, with M = W.T @ W (F, F)
    # precomputed in the wrapper and resident in VMEM across all grid steps.
    y = jnp.dot(x, m_ref[...], preferred_element_type=jnp.float32)
    y = y + b_ref[...]        # (1, F) broadcasts over the batch tile

    # SoLU: y * softmax(y, axis=-1), max-stabilized.
    mx = jnp.max(y, axis=-1, keepdims=True)
    e = jnp.exp(y - mx)                                        # EUP
    denom = jnp.sum(e, axis=-1, keepdims=True)
    sm = e * pl.reciprocal(denom, approx=True)                 # EUP vrcp, ~2^-12 rel err
    y = y * sm

    # LayerNorm over features (matches the module's custom LayerNorm).
    y = y - jnp.mean(y, axis=-1, keepdims=True)
    inv_scale = lax.rsqrt(jnp.mean(y * y, axis=-1, keepdims=True) + 1e-5)  # EUP
    y = y * inv_scale
    o_ref[...] = y * ln_w_ref[...] + ln_b_ref[...]


def layer_norm_toy_forward(x, W, b, ln_w, ln_b, *, tb_target=4096):
    """x: (batch, features) f32. Returns (out, 0) like the PyTorch module."""
    x = x.astype(jnp.float32)
    W = W.astype(jnp.float32)
    B, F = x.shape
    N, F2 = W.shape
    assert F == F2, "W must be (neurons, features)"

    # Algebraic fusion of the two einsums: x @ W.T @ W == x @ (W.T @ W).
    M = jnp.dot(W.T, W, preferred_element_type=jnp.float32)    # (F, F), tiny
    b2 = b.reshape(1, F).astype(jnp.float32)
    ln_w2 = ln_w.reshape(1, F).astype(jnp.float32)
    ln_b2 = ln_b.reshape(1, F).astype(jnp.float32)

    TB, B_pad, n_steps = _choose_batch_tiling(B, tb_target)
    if B_pad != B:
        # Padded rows are independent, computed and then sliced away (eps keeps
        # the LN rsqrt finite on all-zero rows), so this is safe.
        x = jnp.pad(x, ((0, B_pad - B), (0, 0)))

    grid = (n_steps,)

    out = pl.pallas_call(
        _toy_kernel,
        out_shape=jax.ShapeDtypeStruct((B_pad, F), jnp.float32),
        grid_spec=pltpu.PrefetchScalarGridSpec(
            num_scalar_prefetch=0,
            grid=grid,
            in_specs=[
                pl.BlockSpec((TB, F), lambda i: (i, 0)),   # x: batch-tiled, pipelined
                pl.BlockSpec((F, F), lambda i: (0, 0)),    # M = W.T @ W: resident
                pl.BlockSpec((1, F), lambda i: (0, 0)),    # b: resident
                pl.BlockSpec((1, F), lambda i: (0, 0)),    # ln.w: resident
                pl.BlockSpec((1, F), lambda i: (0, 0)),    # ln.b: resident
            ],
            out_specs=pl.BlockSpec((TB, F), lambda i: (i, 0)),
        ),
        compiler_params=pltpu.CompilerParams(
            dimension_semantics=("parallel",),             # v7x: 2-TC grid split
            vmem_limit_bytes=32 * 1024 * 1024,             # safe on v5e/v6e/v7x
        ),
    )(x, M, b2, ln_w2, ln_b2)

    if B_pad != B:
        out = out[:B]
    return out, 0


if __name__ == "__main__":
    neurons, features, batch = 5, 20, 64   # small, but batch>=16 exercises a 2-step grid

    key = jax.random.PRNGKey(0)
    k_w, k_b, k_x = jax.random.split(key, 3)

    # Deterministic parameter init mirroring the module's __init__:
    #   W ~ randn(neurons, features), b ~ randn(features),
    #   ln.w = ones(features), ln.b = zeros(features)
    W = jax.random.normal(k_w, (neurons, features), dtype=jnp.float32)
    b = jax.random.normal(k_b, (features,), dtype=jnp.float32)
    ln_w = jnp.ones((features,), dtype=jnp.float32)
    ln_b = jnp.zeros((features,), dtype=jnp.float32)

    x = jax.random.normal(k_x, (batch, features), dtype=jnp.float32)

    out, aux = layer_norm_toy_forward(x, W, b, ln_w, ln_b)
    out = jax.block_until_ready(out)

    # Pure-JAX reference (same math as the PyTorch module, un-fused matmuls).
    h_ref = x @ W.T
    y_ref = h_ref @ W + b
    y_ref = y_ref * jax.nn.softmax(y_ref, axis=-1)
    y_ref = y_ref - y_ref.mean(-1, keepdims=True)
    y_ref = y_ref / jnp.sqrt((y_ref ** 2).mean(-1, keepdims=True) + 1e-5)
    y_ref = y_ref * ln_w + ln_b

    # 2e-3 tolerance: covers the two approximate EUP ops (lax.rsqrt and the
    # approx reciprocal in the softmax denominator, both ~2^-12 rel err) plus
    # low-order-bit differences from the W.T@W matmul fusion.
    assert jnp.allclose(out, y_ref, atol=2e-3, rtol=2e-3), "mismatch vs reference"
    assert aux == 0

    print("KERNEL_OK")
</pallas_src>

<mosaic_0001>
module attributes {stable_mosaic.version = 11 : i64} {
  func.func @_toy_kernel(%arg0: i32, %arg1: memref<32x20xf32, #tpu.memory_space<vmem>>, %arg2: memref<20x20xf32, #tpu.memory_space<vmem>>, %arg3: memref<1x20xf32, #tpu.memory_space<vmem>>, %arg4: memref<1x20xf32, #tpu.memory_space<vmem>>, %arg5: memref<1x20xf32, #tpu.memory_space<vmem>>, %arg6: memref<32x20xf32, #tpu.memory_space<vmem>>) attributes {dimension_semantics = [#tpu.dimension_semantics<parallel>], iteration_bounds = array<i64: 2>, scalar_prefetch = 0 : i64, scratch_operands = 0 : i64, tpu.core_type = #tpu.core_type<tc>, window_params = [{transform_indices = @transform_0, window_bounds = array<i64: 32, 20>}, {pipeline_mode = #tpu.pipeline_mode<synchronous>, transform_indices = @transform_1, window_bounds = array<i64: 20, 20>}, {pipeline_mode = #tpu.pipeline_mode<synchronous>, transform_indices = @transform_2, window_bounds = array<i64: 1, 20>}, {pipeline_mode = #tpu.pipeline_mode<synchronous>, transform_indices = @transform_3, window_bounds = array<i64: 1, 20>}, {pipeline_mode = #tpu.pipeline_mode<synchronous>, transform_indices = @transform_4, window_bounds = array<i64: 1, 20>}, {transform_indices = @transform_5, window_bounds = array<i64: 32, 20>}]} {
    %c0 = arith.constant 0 : index
    %c0_0 = arith.constant 0 : index
    %0 = vector.load %arg1[%c0, %c0_0] : memref<32x20xf32, #tpu.memory_space<vmem>>, vector<32x20xf32>
    %c0_1 = arith.constant 0 : index
    %c0_2 = arith.constant 0 : index
    %1 = vector.load %arg2[%c0_1, %c0_2] : memref<20x20xf32, #tpu.memory_space<vmem>>, vector<20x20xf32>
    %cst = arith.constant dense<0.000000e+00> : vector<32x20xf32>
    %2 = tpu.matmul %0, %1, %cst {dimension_numbers = #tpu.dot_dimension_numbers<[1], [0], [0], [1], [0, 0, 1, 1], [], []>} : vector<32x20xf32>, vector<20x20xf32>, vector<32x20xf32> -> vector<32x20xf32>
    %c0_3 = arith.constant 0 : index
    %c0_4 = arith.constant 0 : index
    %3 = vector.load %arg3[%c0_3, %c0_4] : memref<1x20xf32, #tpu.memory_space<vmem>>, vector<1x20xf32>
    %4 = vector.broadcast %3 : vector<1x20xf32> to vector<32x20xf32>
    %5 = arith.addf %2, %4 : vector<32x20xf32>
    %cst_5 = arith.constant dense<0xFF800000> : vector<32xf32>
    %6 = vector.multi_reduction <maximumf>, %5, %cst_5 [1] : vector<32x20xf32> to vector<32xf32>
    %7 = vector.shape_cast %6 : vector<32xf32> to vector<32x1xf32>
    %8 = vector.broadcast %7 : vector<32x1xf32> to vector<32x20xf32>
    %9 = arith.subf %5, %8 : vector<32x20xf32>
    %10 = math.exp %9 : vector<32x20xf32>
    %cst_6 = arith.constant dense<0.000000e+00> : vector<32xf32>
    %11 = vector.multi_reduction <add>, %10, %cst_6 [1] : vector<32x20xf32> to vector<32xf32>
    %12 = vector.shape_cast %11 : vector<32xf32> to vector<32x1xf32>
    %13 = tpu.reciprocal %12 {approx = true} : vector<32x1xf32> -> vector<32x1xf32>
    %14 = vector.broadcast %13 : vector<32x1xf32> to vector<32x20xf32>
    %15 = arith.mulf %10, %14 : vector<32x20xf32>
    %16 = arith.mulf %5, %15 : vector<32x20xf32>
    %cst_7 = arith.constant dense<0.000000e+00> : vector<32xf32>
    %17 = vector.multi_reduction <add>, %16, %cst_7 [1] : vector<32x20xf32> to vector<32xf32>
    %18 = vector.shape_cast %17 : vector<32xf32> to vector<32x1xf32>
    %cst_8 = arith.constant 2.000000e+01 : f32
    %19 = vector.broadcast %cst_8 : f32 to vector<32x1xf32>
    %20 = arith.divf %18, %19 : vector<32x1xf32>
    %21 = vector.broadcast %20 : vector<32x1xf32> to vector<32x20xf32>
    %22 = arith.subf %16, %21 : vector<32x20xf32>
    %23 = arith.mulf %22, %22 : vector<32x20xf32>
    %cst_9 = arith.constant dense<0.000000e+00> : vector<32xf32>
    %24 = vector.multi_reduction <add>, %23, %cst_9 [1] : vector<32x20xf32> to vector<32xf32>
    %25 = vector.shape_cast %24 : vector<32xf32> to vector<32x1xf32>
    %cst_10 = arith.constant 2.000000e+01 : f32
    %26 = vector.broadcast %cst_10 : f32 to vector<32x1xf32>
    %27 = arith.divf %25, %26 : vector<32x1xf32>
    %cst_11 = arith.constant 9.99999974E-6 : f32
    %28 = vector.broadcast %cst_11 : f32 to vector<32x1xf32>
    %29 = arith.addf %27, %28 : vector<32x1xf32>
    %30 = math.rsqrt %29 : vector<32x1xf32>
    %31 = vector.broadcast %30 : vector<32x1xf32> to vector<32x20xf32>
    %32 = arith.mulf %22, %31 : vector<32x20xf32>
    %c0_12 = arith.constant 0 : index
    %c0_13 = arith.constant 0 : index
    %33 = vector.load %arg4[%c0_12, %c0_13] : memref<1x20xf32, #tpu.memory_space<vmem>>, vector<1x20xf32>
    %34 = vector.broadcast %33 : vector<1x20xf32> to vector<32x20xf32>
    %35 = arith.mulf %32, %34 : vector<32x20xf32>
    %c0_14 = arith.constant 0 : index
    %c0_15 = arith.constant 0 : index
    %36 = vector.load %arg5[%c0_14, %c0_15] : memref<1x20xf32, #tpu.memory_space<vmem>>, vector<1x20xf32>
    %37 = vector.broadcast %36 : vector<1x20xf32> to vector<32x20xf32>
    %38 = arith.addf %35, %37 : vector<32x20xf32>
    %c0_16 = arith.constant 0 : index
    %c0_17 = arith.constant 0 : index
    %39 = vector.load %arg6[%c0_16, %c0_17] : memref<32x20xf32, #tpu.memory_space<vmem>>, vector<32x20xf32>
    tpu.vector_store %arg6[%c0_16, %c0_17], %38 {strides = array<i32>} : memref<32x20xf32, #tpu.memory_space<vmem>>, vector<32x20xf32>,
    return
  }
  func.func @transform_0(%arg0: i32) -> (i32, i32) {
    %c0_i32 = arith.constant 0 : i32
    %c0_i32_0 = arith.constant 0 : i32
    return %arg0, %c0_i32 : i32, i32
  }
  func.func @transform_1(%arg0: i32) -> (i32, i32) {
    %c0_i32 = arith.constant 0 : i32
    %c0_i32_0 = arith.constant 0 : i32
    %c0_i32_1 = arith.constant 0 : i32
    return %c0_i32, %c0_i32_0 : i32, i32
  }
  func.func @transform_2(%arg0: i32) -> (i32, i32) {
    %c0_i32 = arith.constant 0 : i32
    %c0_i32_0 = arith.constant 0 : i32
    %c0_i32_1 = arith.constant 0 : i32
    return %c0_i32, %c0_i32_0 : i32, i32
  }
  func.func @transform_3(%arg0: i32) -> (i32, i32) {
    %c0_i32 = arith.constant 0 : i32
    %c0_i32_0 = arith.constant 0 : i32
    %c0_i32_1 = arith.constant 0 : i32
    return %c0_i32, %c0_i32_0 : i32, i32
  }
  func.func @transform_4(%arg0: i32) -> (i32, i32) {
    %c0_i32 = arith.constant 0 : i32
    %c0_i32_0 = arith.constant 0 : i32
    %c0_i32_1 = arith.constant 0 : i32
    return %c0_i32, %c0_i32_0 : i32, i32
  }
  func.func @transform_5(%arg0: i32) -> (i32, i32) {
    %c0_i32 = arith.constant 0 : i32
    %c0_i32_0 = arith.constant 0 : i32
    return %arg0, %c0_i32 : i32, i32
  }
}

</mosaic_0001>

<bundles_post_ra>
// kernel: tpu_custom_call.1
= control target key start
LH: loop header
LB: loop body
LE: loop exit
PB: predicated region body
PF: predicated region fallthrough
CT: control target
= control target key end

     0   :  { %s643_s18 = smov 0   ;;  %s714_s0 = inlined_call_operand.vmem [shape: f32[64,20], index: 0, kind: input, shape index: {}]   ;;  %s715_s1 = inlined_call_operand.vmem [shape: f32[20,20], index: 1, kind: input, shape index: {}]   ;;  %s716_s2 = inlined_call_operand.vmem [shape: f32[1,20], index: 2, kind: input, shape index: {}]   ;;  %s717_s3 = inlined_call_operand.vmem [shape: f32[1,20], index: 3, kind: input, shape index: {}]   ;;  %s718_s4 = inlined_call_operand.vmem [shape: f32[1,20], index: 4, kind: input, shape index: {}]   ;;  %s719_s5 = inlined_call_operand.vmem [shape: f32[64,20], index: 5, kind: output, shape index: {}]  }
   0x1 LB: > { %s527_s19 = sadd.s32 4294967295, %s611_s18   ;;  %p531_p0 = scmp.ge.s32.totalorder %s611_s18, 1  ;;  %s611_s18 = sphi %s643_s18, %s15_s18  }
   0x2   : > { %p188_p1 = scmp.lt.s32.totalorder %s611_s18, 3 }
   0x4   : > { %p189_p2 = pnand %p531_p0, %p188_p1 }
   0x5   : > { %v232_v0 = vld [vmem:[%s715_s1] sm:$0xff] (!%p189_p2)  ;;  %v233_v1 = vld [vmem:[%s715_s1 + $0x8] sm:$0xff] (!%p189_p2)  ;;  %s532_s24 = sshll.u32 (!%p189_p2), %s527_s19, 2  ;;  %v234_v3 = vld [vmem:[%s715_s1 + $0x10] sm:$0xf] (!%p189_p2)  ;;  %vm255_vm0 = vcmask (!%p189_p2), 1043456  }
   0x6   : > { %192 = sbr.rel (%p189_p2) target bundleno = 871 (0x367), region = 40  ;;  %v565_v2 = vpack.c.bf16 (!%p189_p2), %v233_v1, %v232_v0  ;;  %p217_p3 = scmp.lt.s32.totalorder (!%p189_p2), %s532_s24, 7  ;;  %vm242_vm1 = vcmask (!%p189_p2), 162816   ;;  %v536_v8 = vld [vmem:[%s716_s2] ss:$0 sm:$0xff] (!%p189_p2) }
   0x8   : > { %566 = vmatprep.subr.bf16.mxu0 (!%p189_p2), %v565_v2  ;;  %569 = vmatprep.subr.bf16.mxu1 (!%p189_p2), %v565_v2 }
   0x9   : > { %568 = vmatpush3.bf16.msra.mxu0 (!%p189_p2), %v565_v2  ;;  %571 = vmatpush3.bf16.msra.mxu1 (!%p189_p2), %v565_v2 }
   0xa   : > { %557 = vmatprep.subr.msk.mxu0 (!%p189_p2), %vm255_vm0, %v234_v3  ;;  %570 = vmatprep.subr.msk.mxu1 (!%p189_p2), %vm255_vm0, %v234_v3 }
   0xd   : > { %s721_s24 = smov (!%p217_p3, %s532_s24), 7  ;;  %558 = vmatpush3.msk.msra.mxu0 %vm255_vm0, %v234_v3  ;;  %572 = vmatpush3.msk.msra.mxu1 %vm255_vm0, %v234_v3 }
   0xe   : > { %s533_s27 = sshll.u32 %s721_s24, 3 }
   0xf   : > { %s220_s30 = scalar_lea.vmem %s714_s0, %s533_s27  ;;  %s226_s14 = scalar_lea.vmem %s719_s5, %s533_s27 }
  0x10   : > { %v228_v4 = vld [vmem:[%s220_s30] sm:$0xff]  ;;  %v230_v5 = vld [vmem:[%s220_s30 + $0x10] sm:$0xff]  ;;  %v229_v6 = vld [vmem:[%s220_s30 + $0x8] sm:$0xff] }
  0x11   : > { %v231_v7 = vld [vmem:[%s220_s30 + $0x18] sm:$0xff]  ;;  %559 = vmatprep.mubr.msk.f32.mxu0 %vm242_vm1, %v228_v4  ;;  %562 = vmatprep.mubr.msk.f32.mxu1 %vm242_vm1, %v230_v5 }
  0x12   : > { %560 = vmatmul.mubr.msk.f32.vlgmr.msra.gmra.mrb[0].mxu0 %vm242_vm1, %v229_v6  ;;  %563 = vmatmul.mubr.msk.f32.vlgmr.msra.gmra.mrb[0].mxu1 %vm242_vm1, %v231_v7 }
  0xe5   : > { %v561_v9 = vpop.f32.mrb[0].mxu0  ;;  %v564_v10 = vpop.f32.mrb[0].mxu1 }
  0xe6   : > { %v325_v11 = vpop.f32.mrb[1].mxu0  ;;  %v335_v12 = vpop.f32.mrb[1].mxu1  ;;  %v675_v13 = vadd.f32 %v564_v10, %v536_v8  ;;  %v331_v16 = vadd.f32 %v561_v9, %v536_v8 }
  0xe7   : > { %v326_v14 = vadd.f32 %v536_v8, %v325_v11  ;;  %v336_v15 = vadd.f32 %v536_v8, %v335_v12 }
  0xe8   : > { %v353_v19 = vsel %vm242_vm1, %v675_v13, -inf  ;;  %v347_v20 = vsel %vm242_vm1, %v331_v16, -inf }
  0xe9   : > { %v350_v17 = vsel %vm242_vm1, %v336_v15, -inf  ;;  %v344_v18 = vsel %vm242_vm1, %v326_v14, -inf }
  0xea   : > { %351 = vmax.xlane.f32.xlu1 %v350_v17  ;;  %345 = vmax.xlane.f32.xlu0 %v344_v18 }
  0xee   : > { %354 = vmax.xlane.f32.xlu1 %v353_v19  ;;  %348 = vmax.xlane.f32.xlu0 %v347_v20 }
 0x177   : > { %v352_v21 = vpop.xlane.xlu1 %351  ;;  %v346_v22 = vpop.xlane.xlu0 %345 }
 0x178   : > { %v358_v23 = vsub.f32 %v336_v15, %v352_v21  ;;  %v356_v24 = vsub.f32 %v326_v14, %v346_v22 }
 0x17a   : > { %v360_v25 = vmul.f32 1.442695, %v356_v24  ;;  %v364_v26 = vmul.f32 1.442695, %v358_v23 }
 0x17b   : > { %v355_v27 = vpop.xlane.xlu1 %354  ;;  %v349_v28 = vpop.xlane.xlu0 %348 }
 0x17c   : > { %v359_v29 = vsub.f32 %v675_v13, %v355_v27  ;;  %v357_v30 = vsub.f32 %v331_v16, %v349_v28  ;;  %581 = vpow2.f32 %v360_v25 }
 0x17d   : > { %583 = vpow2.f32 %v364_v26 }
 0x17e   : > { %v362_v31 = vmul.f32 1.442695, %v357_v30  ;;  %v366_v32 = vmul.f32 1.442695, %v359_v29  ;;  %v542_v30 = vld [vmem:[%s717_s3] ss:$0 sm:$0xff] }
 0x180   : > { %585 = vpow2.f32 %v362_v31 }
 0x181   : > { %587 = vpow2.f32 %v366_v32  ;;  %v543_v32 = vld [vmem:[%s718_s4] ss:$0 sm:$0xff] }
 0x186   : > { %v582_v33 = vpop.eup %581 }
 0x187   : > { %v368_v34 = vsel %vm242_vm1, %v582_v33, 0.0  ;;  %v584_v35 = vpop.eup %583 }
 0x188   : > { %369 = vadd.xlane.f32.xlu0 %v368_v34  ;;  %v374_v37 = vsel %vm242_vm1, %v584_v35, 0.0 }
 0x18a   : > { %v586_v36 = vpop.eup %585 }
 0x18b   : > { %v371_v38 = vsel %vm242_vm1, %v586_v36, 0.0  ;;  %v588_v39 = vpop.eup %587 }
 0x18c   : > { %375 = vadd.xlane.f32.xlu0 %v374_v37  ;;  %372 = vadd.xlane.f32.xlu1 %v371_v38  ;;  %v377_v40 = vsel %vm242_vm1, %v588_v39, 0.0 }
 0x190   : > { %378 = vadd.xlane.f32.xlu1 %v377_v40 }
 0x215   : > { %v370_v41 = vpop.xlane.xlu0 %369 }
 0x216   : > { %589 = vrcp.f32 %v370_v41 }
 0x219   : > { %v373_v42 = vpop.xlane.xlu1 %372  ;;  %v376_v43 = vpop.xlane.xlu0 %375 }
 0x21a   : > { %591 = vrcp.f32 %v373_v42 }
 0x21b   : > { %593 = vrcp.f32 %v376_v43 }
 0x21d   : > { %v379_v44 = vpop.xlane.xlu1 %378 }
 0x21e   : > { %595 = vrcp.f32 %v379_v44 }
 0x220   : > { %v590_v45 = vpop.eup %589 }
 0x221   : > { %v384_v46 = vmul.f32 %v590_v45, %v582_v33 }
 0x223   : > { %v388_v47 = vmul.f32 %v384_v46, %v326_v14 }
 0x224   : > { %v592_v48 = vpop.eup %591 }
 0x225   : > { %v594_v49 = vpop.eup %593  ;;  %v392_v50 = vsel %vm242_vm1, %v388_v47, 0.0  ;;  %v385_v51 = vmul.f32 %v592_v48, %v586_v36 }
 0x226   : > { %393 = vadd.xlane.f32.xlu0 %v392_v50  ;;  %v386_v52 = vmul.f32 %v594_v49, %v584_v35 }
 0x227   : > { %v389_v53 = vmul.f32 %v385_v51, %v331_v16 }
 0x228   : > { %v596_v54 = vpop.eup %595  ;;  %v390_v55 = vmul.f32 %v386_v52, %v336_v15 }
 0x229   : > { %v395_v56 = vsel %vm242_vm1, %v389_v53, 0.0  ;;  %v387_v57 = vmul.f32 %v596_v54, %v588_v39 }
 0x22a   : > { %396 = vadd.xlane.f32.xlu1 %v395_v56  ;;  %v398_v58 = vsel %vm242_vm1, %v390_v55, 0.0 }
 0x22b   : > { %399 = vadd.xlane.f32.xlu0 %v398_v58  ;;  %v391_v59 = vmul.f32 %v387_v57, %v675_v13 }
 0x22d   : > { %v401_v60 = vsel %vm242_vm1, %v391_v59, 0.0 }
 0x22e   : > { %402 = vadd.xlane.f32.xlu1 %v401_v60 }
 0x2b3   : > { %v394_v61 = vpop.xlane.xlu0 %393 }
 0x2b4   : > { %v405_v62 = vmul.f32 0.05, %v394_v61 }
 0x2b6   : > { %v409_v63 = vsub.f32 %v388_v47, %v405_v62 }
 0x2b7   : > { %v397_v0 = vpop.xlane.xlu1 %396 }
 0x2b8   : > { %v406_v1 = vmul.f32 0.05, %v397_v0  ;;  %v400_v2 = vpop.xlane.xlu0 %399  ;;  %v413_v3 = vmul.f32 %v409_v63, %v409_v63 }
 0x2b9   : > { %v407_v4 = vmul.f32 0.05, %v400_v2 }
 0x2ba   : > { %v410_v5 = vsub.f32 %v389_v53, %v406_v1  ;;  %v417_v6 = vsel %vm242_vm1, %v413_v3, 0.0 }
 0x2bb   : > { %v411_v7 = vsub.f32 %v390_v55, %v407_v4  ;;  %v403_v8 = vpop.xlane.xlu1 %402  ;;  %418 = vadd.xlane.f32.xlu0 %v417_v6 }
 0x2bc   : > { %v408_v9 = vmul.f32 0.05, %v403_v8  ;;  %v414_v10 = vmul.f32 %v410_v5, %v410_v5 }
 0x2bd   : > { %v415_v11 = vmul.f32 %v411_v7, %v411_v7 }
 0x2be   : > { %v412_v12 = vsub.f32 %v391_v59, %v408_v9  ;;  %v420_v13 = vsel %vm242_vm1, %v414_v10, 0.0 }
 0x2bf   : > { %421 = vadd.xlane.f32.xlu1 %v420_v13  ;;  %v423_v14 = vsel %vm242_vm1, %v415_v11, 0.0 }
 0x2c0   : > { %424 = vadd.xlane.f32.xlu0 %v423_v14  ;;  %v416_v15 = vmul.f32 %v412_v12, %v412_v12 }
 0x2c2   : > { %v426_v16 = vsel %vm242_vm1, %v416_v15, 0.0 }
 0x2c3   : > { %427 = vadd.xlane.f32.xlu1 %v426_v16 }
 0x348   : > { %v419_v17 = vpop.xlane.xlu0 %418 }
 0x349   : > { %v429_v18 = vmul.f32 0.05, %v419_v17 }
 0x34b   : > { %v433_v19 = vadd.f32 1e-05, %v429_v18 }
 0x34c   : > { %v422_v20 = vpop.xlane.xlu1 %421 }
 0x34d   : > { %597 = vrsqrt.f32 %v433_v19  ;;  %v430_v21 = vmul.f32 0.05, %v422_v20  ;;  %v425_v22 = vpop.xlane.xlu0 %424 }
 0x34e   : > { %v431_v23 = vmul.f32 0.05, %v425_v22 }
 0x34f   : > { %v434_v24 = vadd.f32 1e-05, %v430_v21 }
 0x350   : > { %v435_v25 = vadd.f32 1e-05, %v431_v23  ;;  %v428_v26 = vpop.xlane.xlu1 %427 }
 0x351   : > { %599 = vrsqrt.f32 %v434_v24  ;;  %v432_v27 = vmul.f32 0.05, %v428_v26 }
 0x352   : > { %601 = vrsqrt.f32 %v435_v25 }
 0x353   : > { %v436_v28 = vadd.f32 1e-05, %v432_v27 }
 0x355   : > { %603 = vrsqrt.f32 %v436_v28 }
 0x357   : > { %v598_v29 = vpop.eup %597 }
 0x358   : > { %v441_v31 = vmul.f32 %v598_v29, %v409_v63 }
 0x35a   : > { %v452_v33 = vmul.f32 %v542_v30, %v441_v31 }
 0x35b   : > { %v600_v34 = vpop.eup %599 }
 0x35c   : > { %v602_v35 = vpop.eup %601  ;;  %v463_v36 = vadd.f32 %v543_v32, %v452_v33  ;;  %v442_v37 = vmul.f32 %v600_v34, %v410_v5 }
 0x35d   : > { %v443_v38 = vmul.f32 %v602_v35, %v411_v7 }
 0x35e   : > { %467 = vst.msk [vmem:[%s226_s14] sm:$0xff] %vm242_vm1, %v463_v36  ;;  %v453_v39 = vmul.f32 %v542_v30, %v442_v37 }
 0x35f   : > { %v604_v40 = vpop.eup %603  ;;  %v454_v41 = vmul.f32 %v542_v30, %v443_v38 }
 0x360   : > { %v464_v42 = vadd.f32 %v543_v32, %v453_v39  ;;  %v444_v43 = vmul.f32 %v604_v40, %v412_v12 }
 0x361   : > { %v465_v44 = vadd.f32 %v543_v32, %v454_v41 }
 0x362   : > { %468 = vst.msk [vmem:[%s226_s14 + $0x8] sm:$0xff] %vm242_vm1, %v464_v42  ;;  %v455_v45 = vmul.f32 %v542_v30, %v444_v43 }
 0x363   : > { %469 = vst.msk [vmem:[%s226_s14 + $0x10] sm:$0xff] %vm242_vm1, %v465_v44 }
 0x364   : > { %v466_v46 = vadd.f32 %v543_v32, %v455_v45 }
 0x366   : > { %470 = vst.msk [vmem:[%s226_s14 + $0x18] sm:$0xff] %vm242_vm1, %v466_v46 }
 0x367 PF: > { %s15_s18 = sadd.s32 1, %s611_s18  }
 0x368   : > { %p12_p4 = scmp.ge.s32.totalorder %s15_s18, 4  }
 0x36a   :  { %14 = sbr.rel (!%p12_p4) target bundleno = 1 (0x1), region = 70 }

</bundles_post_ra>
